<compile_context>
chip_gen: v7x
topology: tpu7x:2x2x1
jax: 0.10.0
libtpu: 0.0.40
codegen_flags: <defaults>
</compile_context>

<pallas_src>
import functools

import jax
import jax.numpy as jnp
from jax.experimental import pallas as pl
from jax.experimental.pallas import tpu as pltpu


_LRELU_SLOPE = 0.2
_D_PAD = 128    # lane padding for hidden feature dims (max hidden = 32)
_IN_PAD = 16    # input padded 6 -> 16 features (one bf16 sublane tile); lane 15 = 1.0 carry
_OUT_PAD = 8    # output padded 2 -> 8 lanes


def _leaky_relu(x, alpha=_LRELU_SLOPE):
    # max(x, a*x) == LeakyReLU(x) for 0 < a < 1; 2 VALU ops per vreg.
    return jnp.maximum(x, alpha * x)


def _fc_kernel(x_ref, w_ref, o_ref, *, n_layers):
    # x_ref: [Bt, 16] f32; lanes 0..5 = features, lane 15 = 1.0 (bias carry).
    # w_ref: [n_layers, 128, 128] bf16; each layer's bias lives in its carry
    #        row, and an identity entry keeps output lane 127 == 1.0 through
    #        every hidden layer (LeakyReLU(1) == 1, LeakyReLU(0) == 0 keeps the
    #        zero padding exact).
    # o_ref: [Bt, 8] f32; columns >= 2 are zero.
    h = jnp.dot(x_ref[...].astype(jnp.bfloat16), w_ref[0, :_IN_PAD, :],
                preferred_element_type=jnp.float32)
    h = _leaky_relu(h)
    for l in range(1, n_layers):
        h = jnp.dot(h.astype(jnp.bfloat16), w_ref[l],
                    preferred_element_type=jnp.float32)
        if l < n_layers - 1:          # final Linear has no activation
            h = _leaky_relu(h)
    o_ref[...] = h[:, :_OUT_PAD].astype(o_ref.dtype)


def pack_params(params):
    """Pack per-layer (W[in,out], b[1,out]) into one bf16 weight slab with the
    biases folded in via the ones carry lane."""
    n_layers = len(params)
    w_slab = jnp.zeros((n_layers, _D_PAD, _D_PAD), jnp.float32)
    carry_in = _IN_PAD - 1            # carry lane of the layer input
    for l, (w, b) in enumerate(params):
        fi, fo = w.shape
        w_slab = w_slab.at[l, :fi, :fo].set(w.astype(jnp.float32))
        # bias = extra weight row multiplying the 1.0 carry lane
        w_slab = w_slab.at[l, carry_in, :fo].set(b.reshape(-1).astype(jnp.float32))
        if l < n_layers - 1:
            # propagate the 1.0 carry to output lane 127 for the next layer
            w_slab = w_slab.at[l, carry_in, _D_PAD - 1].set(1.0)
        carry_in = _D_PAD - 1
    return w_slab.astype(jnp.bfloat16)


def _round_up(n, m):
    return ((n + m - 1) // m) * m


def fc_forward(x, params, *, batch_tile=None):
    """x: [B, in_features] float32.  params: list of (W[in,out], b[1,out])."""
    B, fin = x.shape
    assert fin <= _IN_PAD - 1, "input features must fit below the carry lane"
    out_features = params[-1][0].shape[1]
    assert out_features <= _OUT_PAD
    n_layers = len(params)

    if batch_tile is None:
        if B <= 1024:
            batch_tile = B            # grid=(1,): per-step overhead dominates tiny batches
        else:
            # >= 2 grid steps so both v7x TensorCores get work under
            # dimension_semantics=("parallel",); <= 8192 rows keeps the
            # double-buffered blocks + layer intermediates well under the
            # 16 MiB scoped-VMEM default of v5e.
            batch_tile = min(8192, _round_up(pl.cdiv(B, 2), 8))
    b_pad = pl.cdiv(B, batch_tile) * batch_tile

    # Pad features 6 -> 16 with lane 15 = 1.0 (bias carry).  Batch-padding
    # rows (if any) yield garbage from the carried bias but are sliced off.
    xp = jnp.concatenate(
        [x.astype(jnp.float32),
         jnp.zeros((B, _IN_PAD - fin - 1), jnp.float32),
         jnp.ones((B, 1), jnp.float32)], axis=1)
    if b_pad != B:
        xp = jnp.pad(xp, ((0, b_pad - B), (0, 0)))

    w_slab = pack_params(params)

    flops = 2 * B * sum(w.shape[0] * w.shape[1] for w, _ in params)
    bytes_accessed = xp.size * 4 + w_slab.size * 2 + b_pad * _OUT_PAD * 4

    out = pl.pallas_call(
        functools.partial(_fc_kernel, n_layers=n_layers),
        out_shape=jax.ShapeDtypeStruct((b_pad, _OUT_PAD), jnp.float32),
        grid_spec=pl.GridSpec(
            grid=(b_pad // batch_tile,),
            in_specs=[
                pl.BlockSpec((batch_tile, _IN_PAD), lambda i: (i, 0)),
                # weight slab: one full-array block, constant index_map ->
                # resident in VMEM across the whole grid (single DMA).
                pl.BlockSpec((n_layers, _D_PAD, _D_PAD), lambda i: (0, 0, 0)),
            ],
            out_specs=pl.BlockSpec((batch_tile, _OUT_PAD), lambda i: (i, 0)),
        ),
        compiler_params=pltpu.CompilerParams(
            dimension_semantics=("parallel",)),
        cost_estimate=pl.CostEstimate(
            flops=flops, transcendentals=0, bytes_accessed=bytes_accessed),
    )(xp, w_slab)

    # Strip batch / lane padding outside the kernel (cheap: 8-lane slab).
    return out[:B, :out_features]


def init_params(key, in_features=6, out_features=2):
    """Deterministic init mirroring the PyTorch module's layer shapes.
    Each Linear(in, out): weight stored transposed as [in, out], bias [1, out].
    """
    sizes = [in_features, 12, 24, 32, 10, out_features]
    params = []
    for i in range(len(sizes) - 1):
        fan_in, fan_out = sizes[i], sizes[i + 1]
        key, kw, kb = jax.random.split(key, 3)
        bound = 1.0 / jnp.sqrt(fan_in)
        w = jax.random.uniform(kw, (fan_in, fan_out), jnp.float32, -bound, bound)
        b = jax.random.uniform(kb, (1, fan_out), jnp.float32, -bound, bound)
        params.append((w, b))
    return params


def reference_forward(x, params):
    """Plain-JAX f32 reference for correctness checking."""
    h = x
    for i, (w, b) in enumerate(params):
        h = h @ w + b
        if i < len(params) - 1:
            h = jnp.where(h > 0, h, _LRELU_SLOPE * h)
    return h


# TODO(synk): validation_loss_func / loss_figure are host-side training/plot
# utilities with no kernel equivalent; only the forward pass is implemented.

if __name__ == "__main__":
    key = jax.random.PRNGKey(0)
    k_x, k_p = jax.random.split(key)

    batch, in_features, out_features = 16, 6, 2
    x = jax.random.normal(k_x, (batch, in_features), jnp.float32)
    params = init_params(k_p, in_features, out_features)

    out = fc_forward(x, params)
    out = jax.block_until_ready(out)

    ref = reference_forward(x, params)
    assert out.shape == (batch, out_features)
    # bf16 weights / dot inputs -> loosened tolerance vs. the f32 reference.
    assert jnp.allclose(out, ref, atol=5e-2, rtol=5e-2), "mismatch vs reference"

    print("KERNEL_OK")
</pallas_src>

<mosaic_0001>
module attributes {stable_mosaic.version = 11 : i64} {
  func.func @_fc_kernel(%arg0: i32, %arg1: memref<16x16xf32, #tpu.memory_space<vmem>>, %arg2: memref<5x128x128xbf16, #tpu.memory_space<vmem>>, %arg3: memref<16x8xf32, #tpu.memory_space<vmem>>) attributes {dimension_semantics = [#tpu.dimension_semantics<parallel>], iteration_bounds = array<i64: 1>, scalar_prefetch = 0 : i64, scratch_operands = 0 : i64, tpu.core_type = #tpu.core_type<tc>, window_params = [{transform_indices = @transform_0, window_bounds = array<i64: 16, 16>}, {pipeline_mode = #tpu.pipeline_mode<synchronous>, transform_indices = @transform_1, window_bounds = array<i64: 5, 128, 128>}, {transform_indices = @transform_2, window_bounds = array<i64: 16, 8>}]} {
    %c0 = arith.constant 0 : index
    %c0_0 = arith.constant 0 : index
    %0 = vector.load %arg1[%c0, %c0_0] : memref<16x16xf32, #tpu.memory_space<vmem>>, vector<16x16xf32>
    %1 = arith.truncf %0 : vector<16x16xf32> to vector<16x16xbf16>
    %c0_1 = arith.constant 0 : index
    %c0_2 = arith.constant 0 : index
    %c0_3 = arith.constant 0 : index
    %2 = vector.load %arg2[%c0_1, %c0_2, %c0_3] : memref<5x128x128xbf16, #tpu.memory_space<vmem>>, vector<1x16x128xbf16>
    %3 = vector.shape_cast %2 : vector<1x16x128xbf16> to vector<16x128xbf16>
    %cst = arith.constant dense<0.000000e+00> : vector<16x128xf32>
    %4 = tpu.matmul %1, %3, %cst {dimension_numbers = #tpu.dot_dimension_numbers<[1], [0], [0], [1], [0, 0, 1, 1], [], []>} : vector<16x16xbf16>, vector<16x128xbf16>, vector<16x128xf32> -> vector<16x128xf32>
    %cst_4 = arith.constant 2.000000e-01 : f32
    %5 = vector.broadcast %cst_4 : f32 to vector<16x128xf32>
    %6 = arith.mulf %5, %4 : vector<16x128xf32>
    %7 = arith.maximumf %4, %6 : vector<16x128xf32>
    %8 = arith.truncf %7 : vector<16x128xf32> to vector<16x128xbf16>
    %c1 = arith.constant 1 : index
    %c0_5 = arith.constant 0 : index
    %c0_6 = arith.constant 0 : index
    %9 = vector.load %arg2[%c1, %c0_5, %c0_6] : memref<5x128x128xbf16, #tpu.memory_space<vmem>>, vector<1x128x128xbf16>
    %10 = vector.shape_cast %9 : vector<1x128x128xbf16> to vector<128x128xbf16>
    %cst_7 = arith.constant dense<0.000000e+00> : vector<16x128xf32>
    %11 = tpu.matmul %8, %10, %cst_7 {dimension_numbers = #tpu.dot_dimension_numbers<[1], [0], [0], [1], [0, 0, 1, 1], [], []>} : vector<16x128xbf16>, vector<128x128xbf16>, vector<16x128xf32> -> vector<16x128xf32>
    %cst_8 = arith.constant 2.000000e-01 : f32
    %12 = vector.broadcast %cst_8 : f32 to vector<16x128xf32>
    %13 = arith.mulf %12, %11 : vector<16x128xf32>
    %14 = arith.maximumf %11, %13 : vector<16x128xf32>
    %15 = arith.truncf %14 : vector<16x128xf32> to vector<16x128xbf16>
    %c2 = arith.constant 2 : index
    %c0_9 = arith.constant 0 : index
    %c0_10 = arith.constant 0 : index
    %16 = vector.load %arg2[%c2, %c0_9, %c0_10] : memref<5x128x128xbf16, #tpu.memory_space<vmem>>, vector<1x128x128xbf16>
    %17 = vector.shape_cast %16 : vector<1x128x128xbf16> to vector<128x128xbf16>
    %cst_11 = arith.constant dense<0.000000e+00> : vector<16x128xf32>
    %18 = tpu.matmul %15, %17, %cst_11 {dimension_numbers = #tpu.dot_dimension_numbers<[1], [0], [0], [1], [0, 0, 1, 1], [], []>} : vector<16x128xbf16>, vector<128x128xbf16>, vector<16x128xf32> -> vector<16x128xf32>
    %cst_12 = arith.constant 2.000000e-01 : f32
    %19 = vector.broadcast %cst_12 : f32 to vector<16x128xf32>
    %20 = arith.mulf %19, %18 : vector<16x128xf32>
    %21 = arith.maximumf %18, %20 : vector<16x128xf32>
    %22 = arith.truncf %21 : vector<16x128xf32> to vector<16x128xbf16>
    %c3 = arith.constant 3 : index
    %c0_13 = arith.constant 0 : index
    %c0_14 = arith.constant 0 : index
    %23 = vector.load %arg2[%c3, %c0_13, %c0_14] : memref<5x128x128xbf16, #tpu.memory_space<vmem>>, vector<1x128x128xbf16>
    %24 = vector.shape_cast %23 : vector<1x128x128xbf16> to vector<128x128xbf16>
    %cst_15 = arith.constant dense<0.000000e+00> : vector<16x128xf32>
    %25 = tpu.matmul %22, %24, %cst_15 {dimension_numbers = #tpu.dot_dimension_numbers<[1], [0], [0], [1], [0, 0, 1, 1], [], []>} : vector<16x128xbf16>, vector<128x128xbf16>, vector<16x128xf32> -> vector<16x128xf32>
    %cst_16 = arith.constant 2.000000e-01 : f32
    %26 = vector.broadcast %cst_16 : f32 to vector<16x128xf32>
    %27 = arith.mulf %26, %25 : vector<16x128xf32>
    %28 = arith.maximumf %25, %27 : vector<16x128xf32>
    %29 = arith.truncf %28 : vector<16x128xf32> to vector<16x128xbf16>
    %c4 = arith.constant 4 : index
    %c0_17 = arith.constant 0 : index
    %c0_18 = arith.constant 0 : index
    %30 = vector.load %arg2[%c4, %c0_17, %c0_18] : memref<5x128x128xbf16, #tpu.memory_space<vmem>>, vector<1x128x128xbf16>
    %31 = vector.shape_cast %30 : vector<1x128x128xbf16> to vector<128x128xbf16>
    %cst_19 = arith.constant dense<0.000000e+00> : vector<16x128xf32>
    %32 = tpu.matmul %29, %31, %cst_19 {dimension_numbers = #tpu.dot_dimension_numbers<[1], [0], [0], [1], [0, 0, 1, 1], [], []>} : vector<16x128xbf16>, vector<128x128xbf16>, vector<16x128xf32> -> vector<16x128xf32>
    %33 = vector.extract_strided_slice %32 {offsets = [0, 0], sizes = [16, 8], strides = [1, 1]} : vector<16x128xf32> to vector<16x8xf32>
    %c0_20 = arith.constant 0 : index
    %c0_21 = arith.constant 0 : index
    %34 = vector.load %arg3[%c0_20, %c0_21] : memref<16x8xf32, #tpu.memory_space<vmem>>, vector<16x8xf32>
    tpu.vector_store %arg3[%c0_20, %c0_21], %33 {strides = array<i32>} : memref<16x8xf32, #tpu.memory_space<vmem>>, vector<16x8xf32>,
    return
  }
  func.func @transform_0(%arg0: i32) -> (i32, i32) {
    %c0_i32 = arith.constant 0 : i32
    %c0_i32_0 = arith.constant 0 : i32
    return %arg0, %c0_i32 : i32, i32
  }
  func.func @transform_1(%arg0: i32) -> (i32, i32, i32) {
    %c0_i32 = arith.constant 0 : i32
    %c0_i32_0 = arith.constant 0 : i32
    %c0_i32_1 = arith.constant 0 : i32
    %c0_i32_2 = arith.constant 0 : i32
    return %c0_i32, %c0_i32_0, %c0_i32_1 : i32, i32, i32
  }
  func.func @transform_2(%arg0: i32) -> (i32, i32) {
    %c0_i32 = arith.constant 0 : i32
    %c0_i32_0 = arith.constant 0 : i32
    return %arg0, %c0_i32 : i32, i32
  }
}

</mosaic_0001>

<bundles_post_ra>
// kernel: tpu_custom_call.1
= control target key start
LH: loop header
LB: loop body
LE: loop exit
PB: predicated region body
PF: predicated region fallthrough
CT: control target
= control target key end

     0   :  { %7 = vsyncpa [#allocation3], 0  ;;  %s892_s0 = inlined_call_operand.hbm [shape: f32[16,16], index: 0, kind: input, shape index: {}]   ;;  %s893_s1 = inlined_call_operand.hbm [shape: bf16[5,128,128], index: 1, kind: input, shape index: {}]   ;;  %s894_s2 = inlined_call_operand.vmem [shape: f32[16,8], index: 2, kind: output, shape index: {}]  }
   0x1   :  { %8 = vsyncpa [#allocation5], 0  ;;  %s796_s9 = smov [#allocation2]   ;;  %s748_s13 = scalar_lea.hbm %s892_s0, 256 }
   0x2   :  { %s14_s10 = sshll.u32 %s796_s9, 4  ;;  %p749_p0 = scmp.ne.s32.totalorder %s892_s0, %s748_s13  ;;  %s15_s10 = int_to_ptr.vmem [resolvable:$true] %s14_s10 }
   0x3   :  { %p752_p1 = scmp.lt.u32.totalorder %s748_s13, %s892_s0 }
   0x5   :  { %p754_p2 = pnand %p752_p1, %p749_p0 }
   0x7   :  { %757 = shalt.err (!%p754_p2)
}
   0x8   :  { %s758_s18 = scalar_lea.vmem %s15_s10, 256  ;;  %p763_p4 = scmp.lt.s32.totalorder %s15_s10, %s15_s10 }
   0x9   :  { %p759_p3 = scmp.ne.s32.totalorder %s15_s10, %s758_s18  ;;  %p764_p5 = scmp.lt.s32.totalorder %s758_s18, %s758_s18 }
   0xb   :  { %p765_p6 = por %p764_p5, %p763_p4 }
   0xd   :  { %p766_p7 = pnand %p765_p6, %p759_p3 }
   0xf   :  { %769 = shalt.err (!%p766_p7)
}
  0x10   :  { %s797_s19 = smov 128   ;;  %s798_s20 = smov 8  }
  0x11   :  { %20 = dma.hbm_to_vmem [thread:$0]  %s892_s0, 256, %s15_s10, [#allocation3], %s797_s19, %s797_s19, %s798_s20  }
  0x12   :  { %s799_s23 = smov [#allocation4]   ;;  %s770_s27 = scalar_lea.hbm %s893_s1, 5120 }
  0x13   :  { %s26_s24 = sshll.u32 %s799_s23, 4  ;;  %p771_p8 = scmp.ne.s32.totalorder %s893_s1, %s770_s27  ;;  %s27_s24 = int_to_ptr.vmem [resolvable:$true] %s26_s24 }
  0x14   :  { %p774_p9 = scmp.lt.u32.totalorder %s770_s27, %s893_s1 }
  0x16   :  { %p776_p10 = pnand %p774_p9, %p771_p8 }
  0x18   :  { %779 = shalt.err (!%p776_p10)
}
  0x19   :  { %s780_s4 = scalar_lea.vmem %s27_s24, 5120  ;;  %p785_p12 = scmp.lt.s32.totalorder %s27_s24, %s27_s24 }
  0x1a   :  { %p781_p11 = scmp.ne.s32.totalorder %s27_s24, %s780_s4  ;;  %p786_p13 = scmp.lt.s32.totalorder %s780_s4, %s780_s4 }
  0x1c   :  { %p787_p0 = por %p786_p13, %p785_p12 }
  0x1e   :  { %p788_p1 = pnand %p787_p0, %p781_p11 }
  0x20   :  { %791 = shalt.err (!%p788_p1)
}
  0x21   :  { %s800_s0 = smov 64   ;;  %s801_s5 = smov 4  }
  0x22   :  { %32 = dma.hbm_to_vmem [thread:$0]  %s893_s1, 5120, %s27_s24, [#allocation5], %s800_s0, %s800_s0, %s801_s5  }
  0x23   :  { %792 = dma.done.wait [#allocation3], 256  }
  0x24   :  { %793 = vsyncadd [#allocation3], 4294967040 }
  0x25   :  { %794 = dma.done.wait [#allocation5], 5120  }
  0x26   :  { %795 = vsyncadd [#allocation5], 4294962176  ;;  %v802_v0 = vmov 0.0   ;;  %vm803_vm0 = vmmov 0   ;;  %v715_v1 = vld [vmem:[#allocation4] sm:$0xff]   ;;  %v40_v2 = vld [vmem:[#allocation2] sm:$0xff] }
  0x27   :  { %621 = vmatprep.subr.bf16.mxu0 %v802_v0  ;;  %623 = vmatprep.mubr.msk.bf16.mxu0 %vm803_vm0, %v802_v0  ;;  %v41_v3 = vld [vmem:[#allocation2 + $0x8] sm:$0xff]  ;;  %vm51_vm1 = vcmask 130048   ;;  %v716_v5 = vld [vmem:[#allocation4 + $0x40] sm:$0xff]   ;;  %v717_v6 = vld [vmem:[#allocation4 + $0x48] sm:$0xff]   ;;  %vm540_vm2 = vcmask 64512  }
  0x28   :  { %627 = vmatprep.subr.bf16.mxu1 %v802_v0  ;;  %643 = vmatprep.mubr.msk.bf16.mxu1 %vm803_vm0, %v802_v0  ;;  %v42_v4 = vpack.c.bf16 %v41_v3, %v40_v2  ;;  %v718_v7 = vld [vmem:[#allocation4 + $0x50] sm:$0xff]   ;;  %v719_v8 = vld [vmem:[#allocation4 + $0x58] sm:$0xff]   ;;  %v720_v9 = vld [vmem:[#allocation4 + $0x60] sm:$0xff]  }
  0x29   :  { %622 = vmatpush3.bf16.msra.mxu0 %v715_v1  ;;  %628 = vmatpush3.bf16.msra.mxu1 %v716_v5  ;;  %v721_v10 = vld [vmem:[#allocation4 + $0x68] sm:$0xff]   ;;  %v722_v11 = vld [vmem:[#allocation4 + $0x70] sm:$0xff]   ;;  %v723_v12 = vld [vmem:[#allocation4 + $0x78] sm:$0xff]  }
  0x2a   :  { %647 = vmatprep.subr.bf16.mxu0 %v802_v0  ;;  %629 = vmatprep.subr.bf16.mxu1 %v802_v0  ;;  %v724_v13 = vld [vmem:[#allocation4 + $0x80] sm:$0xff]   ;;  %v725_v14 = vld [vmem:[#allocation4 + $0x88] sm:$0xff]   ;;  %v726_v15 = vld [vmem:[#allocation4 + $0x90] sm:$0xff]  }
  0x2b   :  { %v727_v16 = vld [vmem:[#allocation4 + $0x98] sm:$0xff]   ;;  %v728_v17 = vld [vmem:[#allocation4 + $0xa0] sm:$0xff]   ;;  %v729_v18 = vld [vmem:[#allocation4 + $0xa8] sm:$0xff]  }
  0x2c   :  { %624 = vmatmul.mubr.msk.bf16.vlgmr.msra.gmra.mrb[0].mxu0 %vm51_vm1, %v42_v4  ;;  %v730_v28 = vld [vmem:[#allocation4 + $0xb0] sm:$0xff]   ;;  %v731_v29 = vld [vmem:[#allocation4 + $0xb8] sm:$0xff]   ;;  %v732_v30 = vld [vmem:[#allocation4 + $0xc0] sm:$0xff]  }
  0x2d   :  { %663 = vmatprep.mubr.msk.bf16.mxu0 %vm803_vm0, %v802_v0  ;;  %630 = vmatpush3.bf16.msra.mxu1 %v717_v6  ;;  %v733_v31 = vld [vmem:[#allocation4 + $0xc8] sm:$0xff]   ;;  %v734_v32 = vld [vmem:[#allocation4 + $0xd0] sm:$0xff]   ;;  %v735_v33 = vld [vmem:[#allocation4 + $0xd8] sm:$0xff]  }
  0x2e   :  { %631 = vmatprep.subr.bf16.mxu1 %v802_v0  ;;  %648 = vmatpush3.bf16.msra.mxu0 %v724_v13  ;;  %v736_v34 = vld [vmem:[#allocation4 + $0xe0] sm:$0xff]   ;;  %v737_v35 = vld [vmem:[#allocation4 + $0xe8] sm:$0xff]   ;;  %v738_v45 = vld [vmem:[#allocation4 + $0xf0] sm:$0xff]  }
  0x2f   :  { %649 = vmatprep.subr.bf16.mxu0 %v802_v0  ;;  %v739_v46 = vld [vmem:[#allocation4 + $0xf8] sm:$0xff]   ;;  %v740_v47 = vld [vmem:[#allocation4 + $0x100] sm:$0xff]   ;;  %v741_v48 = vld [vmem:[#allocation4 + $0x108] sm:$0xff]  }
  0x30   :  { %v742_v49 = vld [vmem:[#allocation4 + $0x110] sm:$0xff]   ;;  %v743_v50 = vld [vmem:[#allocation4 + $0x118] sm:$0xff]   ;;  %v744_v51 = vld [vmem:[#allocation4 + $0x120] sm:$0xff]  }
  0x31   :  { %632 = vmatpush3.bf16.msra.mxu1 %v718_v7  ;;  %v745_v52 = vld [vmem:[#allocation4 + $0x128] sm:$0xff]   ;;  %v746_v62 = vld [vmem:[#allocation4 + $0x130] sm:$0xff]   ;;  %v747_v63 = vld [vmem:[#allocation4 + $0x138] sm:$0xff]  }
  0x32   :  { %633 = vmatprep.subr.bf16.mxu1 %v802_v0  ;;  %650 = vmatpush3.bf16.msra.mxu0 %v725_v14 }
  0x33   :  { %651 = vmatprep.subr.bf16.mxu0 %v802_v0 }
  0x35   :  { %634 = vmatpush3.bf16.msra.mxu1 %v719_v8 }
  0x36   :  { %635 = vmatprep.subr.bf16.mxu1 %v802_v0  ;;  %652 = vmatpush3.bf16.msra.mxu0 %v726_v15 }
  0x37   :  { %653 = vmatprep.subr.bf16.mxu0 %v802_v0 }
  0x39   :  { %636 = vmatpush3.bf16.msra.mxu1 %v720_v9 }
  0x3a   :  { %637 = vmatprep.subr.bf16.mxu1 %v802_v0  ;;  %654 = vmatpush3.bf16.msra.mxu0 %v727_v16 }
  0x3b   :  { %655 = vmatprep.subr.bf16.mxu0 %v802_v0 }
  0x3d   :  { %638 = vmatpush3.bf16.msra.mxu1 %v721_v10 }
  0x3e   :  { %639 = vmatprep.subr.bf16.mxu1 %v802_v0  ;;  %656 = vmatpush3.bf16.msra.mxu0 %v728_v17 }
  0x3f   :  { %657 = vmatprep.subr.bf16.mxu0 %v802_v0 }
  0x41   :  { %640 = vmatpush3.bf16.msra.mxu1 %v722_v11 }
  0x42   :  { %641 = vmatprep.subr.bf16.mxu1 %v802_v0  ;;  %658 = vmatpush3.bf16.msra.mxu0 %v729_v18 }
  0x43   :  { %659 = vmatprep.subr.bf16.mxu0 %v802_v0 }
  0x45   :  { %642 = vmatpush3.bf16.msra.mxu1 %v723_v12 }
  0x46   :  { %667 = vmatprep.subr.bf16.mxu1 %v802_v0  ;;  %660 = vmatpush3.bf16.msra.mxu0 %v730_v28 }
  0x47   :  { %661 = vmatprep.subr.bf16.mxu0 %v802_v0 }
  0x4a   :  { %662 = vmatpush3.bf16.msra.mxu0 %v731_v29 }
  0x4b   :  { %687 = vmatprep.subr.bf16.mxu0 %v802_v0 }
  0xff   :  { %v89_v19 = vpop.f32.mrb[0].mxu0 }
 0x100   :  { %v96_v20 = vmul.f32 0.2, %v89_v19  ;;  %v625_v21 = vpop.f32.mrb[1].mxu0 }
 0x101   :  { %v92_v22 = vpop.f32.mrb[2].mxu0 }
 0x102   :  { %v97_v23 = vmul.f32 0.2, %v92_v22  ;;  %v626_v24 = vpop.f32.mrb[3].mxu0  ;;  %v98_v25 = vmax.f32 %v89_v19, %v96_v20 }
 0x104   :  { %v99_v26 = vmax.f32 %v92_v22, %v97_v23 }
 0x106   :  { %v100_v27 = vpack.c.bf16 %v99_v26, %v98_v25 }
 0x108   :  { %644 = vmatmul.mubr.bf16.vlgmr.msra.gmra.mrb[0].mxu1 %v100_v27 }
 0x109   :  { %683 = vmatprep.mubr.msk.bf16.mxu1 %vm803_vm0, %v802_v0  ;;  %668 = vmatpush3.bf16.msra.mxu1 %v732_v30 }
 0x10a   :  { %669 = vmatprep.subr.bf16.mxu1 %v802_v0 }
 0x10d   :  { %670 = vmatpush3.bf16.msra.mxu1 %v733_v31 }
 0x10e   :  { %671 = vmatprep.subr.bf16.mxu1 %v802_v0 }
 0x111   :  { %672 = vmatpush3.bf16.msra.mxu1 %v734_v32 }
 0x112   :  { %673 = vmatprep.subr.bf16.mxu1 %v802_v0 }
 0x115   :  { %674 = vmatpush3.bf16.msra.mxu1 %v735_v33 }
 0x116   :  { %675 = vmatprep.subr.bf16.mxu1 %v802_v0 }
 0x119   :  { %676 = vmatpush3.bf16.msra.mxu1 %v736_v34 }
 0x11a   :  { %677 = vmatprep.subr.bf16.mxu1 %v802_v0 }
 0x11d   :  { %678 = vmatpush3.bf16.msra.mxu1 %v737_v35 }
 0x11e   :  { %679 = vmatprep.subr.bf16.mxu1 %v802_v0 }
 0x121   :  { %680 = vmatpush3.bf16.msra.mxu1 %v738_v45 }
 0x122   :  { %681 = vmatprep.subr.bf16.mxu1 %v802_v0 }
 0x125   :  { %682 = vmatpush3.bf16.msra.mxu1 %v739_v46 }
 0x1db   :  { %v200_v36 = vpop.f32.mrb[0].mxu1 }
 0x1dc   :  { %v207_v37 = vmul.f32 0.2, %v200_v36  ;;  %v645_v38 = vpop.f32.mrb[1].mxu1 }
 0x1dd   :  { %v203_v39 = vpop.f32.mrb[2].mxu1 }
 0x1de   :  { %v208_v40 = vmul.f32 0.2, %v203_v39  ;;  %v646_v41 = vpop.f32.mrb[3].mxu1  ;;  %v209_v42 = vmax.f32 %v200_v36, %v207_v37 }
 0x1e0   :  { %v210_v43 = vmax.f32 %v203_v39, %v208_v40 }
 0x1e2   :  { %v211_v44 = vpack.c.bf16 %v210_v43, %v209_v42 }
 0x1e4   :  { %664 = vmatmul.mubr.bf16.vlgmr.msra.gmra.mrb[4].mxu0 %v211_v44 }
 0x1e5   :  { %703 = vmatprep.mubr.msk.bf16.mxu0 %vm803_vm0, %v802_v0  ;;  %688 = vmatpush3.bf16.msra.mxu0 %v740_v47 }
 0x1e6   :  { %689 = vmatprep.subr.bf16.mxu0 %v802_v0 }
 0x1e9   :  { %690 = vmatpush3.bf16.msra.mxu0 %v741_v48 }
 0x1ea   :  { %691 = vmatprep.subr.bf16.mxu0 %v802_v0 }
 0x1ed   :  { %692 = vmatpush3.bf16.msra.mxu0 %v742_v49 }
 0x1ee   :  { %693 = vmatprep.subr.bf16.mxu0 %v802_v0 }
 0x1f1   :  { %694 = vmatpush3.bf16.msra.mxu0 %v743_v50 }
 0x1f2   :  { %695 = vmatprep.subr.bf16.mxu0 %v802_v0 }
 0x1f5   :  { %696 = vmatpush3.bf16.msra.mxu0 %v744_v51 }
 0x1f6   :  { %697 = vmatprep.subr.bf16.mxu0 %v802_v0 }
 0x1f9   :  { %698 = vmatpush3.bf16.msra.mxu0 %v745_v52 }
 0x1fa   :  { %699 = vmatprep.subr.bf16.mxu0 %v802_v0 }
 0x1fd   :  { %700 = vmatpush3.bf16.msra.mxu0 %v746_v62 }
 0x1fe   :  { %701 = vmatprep.subr.bf16.mxu0 %v802_v0 }
 0x201   :  { %702 = vmatpush3.bf16.msra.mxu0 %v747_v63 }
 0x2b7   :  { %v311_v53 = vpop.f32.mrb[4].mxu0 }
 0x2b8   :  { %v318_v54 = vmul.f32 0.2, %v311_v53  ;;  %v665_v55 = vpop.f32.mrb[5].mxu0 }
 0x2b9   :  { %v314_v56 = vpop.f32.mrb[6].mxu0 }
 0x2ba   :  { %v319_v57 = vmul.f32 0.2, %v314_v56  ;;  %v666_v58 = vpop.f32.mrb[7].mxu0  ;;  %v320_v59 = vmax.f32 %v311_v53, %v318_v54 }
 0x2bc   :  { %v321_v60 = vmax.f32 %v314_v56, %v319_v57 }
 0x2be   :  { %v322_v61 = vpack.c.bf16 %v321_v60, %v320_v59 }
 0x2c0   :  { %684 = vmatmul.mubr.bf16.vlgmr.msra.gmra.mrb[4].mxu1 %v322_v61 }
 0x393   :  { %v422_v1 = vpop.f32.mrb[4].mxu1 }
 0x394   :  { %v429_v2 = vmul.f32 0.2, %v422_v1  ;;  %v685_v3 = vpop.f32.mrb[5].mxu1 }
 0x395   :  { %v425_v4 = vpop.f32.mrb[6].mxu1 }
 0x396   :  { %v430_v5 = vmul.f32 0.2, %v425_v4  ;;  %v686_v6 = vpop.f32.mrb[7].mxu1  ;;  %v431_v7 = vmax.f32 %v422_v1, %v429_v2 }
 0x398   :  { %v432_v8 = vmax.f32 %v425_v4, %v430_v5 }
 0x39a   :  { %v433_v9 = vpack.c.bf16 %v432_v8, %v431_v7 }
 0x39c   :  { %704 = vmatmul.mubr.bf16.vlgmr.msra.gmra.mrb[8].mxu0 %v433_v9 }
 0x46f   :  { %v533_v10 = vpop.f32.mrb[8].mxu0 }
 0x470   :  { %541 = vst.msk [vmem:[%s894_s2] sm:$0xff] %vm540_vm2, %v533_v10  ;;  %v705_v11 = vpop.f32.mrb[9].mxu0 }
 0x471   :  { %v536_v0 = vpop.f32.mrb[10].mxu0 }
 0x472   :  { %542 = vst.msk [vmem:[%s894_s2 + $0x8] sm:$0xff] %vm540_vm2, %v536_v0  ;;  %v706_v12 = vpop.f32.mrb[11].mxu0 }
 0x473   :  { %547 = vsyncpa [#allocation3], 1 }
 0x474   :  { %548 = vsyncpa [#allocation5], 1 }

</bundles_post_ra>
